<compile_context>
chip_gen: v5e
topology: v5e:2x2
jax: 0.10.0
libtpu: 0.0.40
codegen_flags: <defaults>
</compile_context>

<pallas_src>
import functools
import math

import numpy as np
import jax
import jax.numpy as jnp
from jax.experimental import pallas as pl
from jax.experimental.pallas import tpu as pltpu


def _naf_kernel(a_min, a_max, d, n_tril, compute_q, matmul_dtype, *refs):
    if compute_q:
        (x_ref, w_ref, b_ref, scat_ref, rows_oh_ref, cols_oh_ref, act_ref,
         mu_ref, v_ref, q_ref, l_ref) = refs
    else:
        (x_ref, w_ref, b_ref, scat_ref,
         mu_ref, v_ref, l_ref) = refs

    x = x_ref[...]                                    # [TB, in_dim] (as produced)
    if x.dtype != matmul_dtype:
        x = x.astype(matmul_dtype)                    # cheap hidden in-kernel cast

    # Fused V / mu / l_entry heads: one lane-dense MXU matmul, f32 accumulation.
    # Column layout of the fused weight: V | mu (d) | raw tril entries (n_tril) | pad.
    y = jnp.dot(x, w_ref[...], preferred_element_type=jnp.float32) + b_ref[...]

    v = y[:, 0:1]                                     # [TB, 1]
    half = (a_max - a_min) * 0.5
    mu = a_min + (jnp.tanh(y[:, 1:1 + d]) + 1.0) * half        # [TB, d]
    e = y[:, 1 + d:1 + d + n_tril]                             # [TB, n_tril]

    # Diagonal mask over tril order, generated in-kernel from iota (no constant DMA):
    # diagonal (r, r) sits at flat index r*(r+3)/2.
    k_iota = jax.lax.broadcasted_iota(jnp.int32, (1, n_tril), 1)
    dmask = k_iota < 0                                # all-False start
    for r in range(d):
        dmask = dmask | (k_iota == (r * (r + 3)) // 2)

    # tril entries: softplus(beta=1, threshold=20) + 1e-6 on the diagonal,
    # clamp(-10, 10) off-diagonal, then nan_to_num (matches torch build_L).
    sp = jnp.where(e > 20.0, e,
                   jnp.log1p(jnp.exp(jnp.minimum(e, 20.0)))) + 1e-6
    proc = jnp.where(dmask, sp, jnp.clip(e, -10.0, 10.0))
    proc = jnp.nan_to_num(proc, nan=0.0, posinf=1e6, neginf=-1e6)

    # Narrow writebacks (HBM traffic is only the useful lanes now).
    mu_ref[...] = mu
    v_ref[...] = v
    # Scatter tril entries into flattened-L columns with one small exact MXU matmul.
    l_ref[...] = jnp.dot(proc, scat_ref[...], preferred_element_type=jnp.float32)

    if compute_q:
        # Q = V - 0.5 * (a - mu)^T L L^T (a - mu) = V - 0.5 * ||L^T (a - mu)||^2
        # m[b, k]  = diff[b, rows[k]]         (one-hot gather matmul)
        # z[b, c]  = sum_k proc*m over cols[k]==c   (one-hot scatter matmul)
        diff = act_ref[...].astype(jnp.float32) - mu                          # [TB, d]
        m = jnp.dot(diff, rows_oh_ref[...], preferred_element_type=jnp.float32)  # [TB, n_tril]
        pm = proc * m
        z = jnp.dot(pm, cols_oh_ref[...], preferred_element_type=jnp.float32)    # [TB, d]
        q_ref[...] = v - 0.5 * jnp.sum(z * z, axis=1, keepdims=True)


class NAFOutput1Pallas:
    """Pallas/TPU implementation of NAFOutput1's forward pass."""

    def __init__(self, input_shape, output_shape, a_max=1.0, a_min=-1.0,
                 key=None, matmul_dtype=jnp.float32, tile_b=1024):
        if isinstance(input_shape, int):
            in_dim = input_shape
        elif isinstance(input_shape, (list, tuple)) and len(input_shape) == 1:
            in_dim = input_shape[0]
        else:
            raise ValueError(f'bad input_shape {input_shape}')
        if isinstance(output_shape, int):
            out_dim = output_shape
        elif isinstance(output_shape, (list, tuple)) and len(output_shape) == 1:
            out_dim = output_shape[0]
        else:
            raise ValueError(f'bad output_shape {output_shape}')

        self.in_dim = in_dim
        self.output_dim = out_dim
        self.output_shape = output_shape
        self.a_min = float(a_min)
        self.a_max = float(a_max)
        self.matmul_dtype = np.dtype(matmul_dtype)
        self.tile_b = int(tile_b)          # multiple of 8; ~6 MiB/step VMEM at 1024

        d = out_dim
        rows, cols = np.tril_indices(d)
        self.n_tril = len(rows)
        self.rows_idx = jnp.asarray(rows, jnp.int32)
        self.cols_idx = jnp.asarray(cols, jnp.int32)
        self.diag_mask_bool = jnp.asarray(rows == cols)

        # Fused-weight column layout:  V | mu (d) | raw tril entries (n_tril) | pad.
        self.out_pad = max(128, int(math.ceil((1 + d + self.n_tril) / 128.0)) * 128)

        # Small constants (kept VMEM-resident across batch tiles):
        #   scat   : tril-order entries -> flattened d*d L
        #   rows_oh: diff row-gather one-hot   (Q path)
        #   cols_oh: column-scatter one-hot    (Q path)
        scat = np.zeros((self.n_tril, d * d), np.float32)
        scat[np.arange(self.n_tril), rows * d + cols] = 1.0
        rows_oh = np.zeros((d, self.n_tril), np.float32)
        rows_oh[rows, np.arange(self.n_tril)] = 1.0
        cols_oh = np.zeros((self.n_tril, d), np.float32)
        cols_oh[np.arange(self.n_tril), cols] = 1.0
        self.scat = jnp.asarray(scat)
        self.rows_oh = jnp.asarray(rows_oh)
        self.cols_oh = jnp.asarray(cols_oh)

        # Deterministic parameter init (nn.Linear default scheme), packed into one
        # zero-padded [in_dim, OUT_PAD] weight so the fused matmul output is lane-dense.
        if key is None:
            key = jax.random.PRNGKey(0)
        bound = 1.0 / math.sqrt(in_dim)
        ks = jax.random.split(key, 6)
        u = lambda k, s: jax.random.uniform(k, s, jnp.float32, -bound, bound)
        v_w = u(ks[0], (1, in_dim))
        v_b = u(ks[1], (1,))
        mu_w = u(ks[2], (d, in_dim))          # row h = weight of mu_heads[h]
        mu_b = u(ks[3], (d,))
        l_w = u(ks[4], (self.n_tril, in_dim))
        l_b = u(ks[5], (self.n_tril,))

        W = jnp.zeros((in_dim, self.out_pad), jnp.float32)
        W = W.at[:, 0].set(v_w[0])
        W = W.at[:, 1:1 + d].set(mu_w.T)
        W = W.at[:, 1 + d:1 + d + self.n_tril].set(l_w.T)
        b = jnp.zeros((1, self.out_pad), jnp.float32)
        b = b.at[0, 0].set(v_b[0])
        b = b.at[0, 1:1 + d].set(mu_b)
        b = b.at[0, 1 + d:1 + d + self.n_tril].set(l_b)

        self.W_f32 = W                                # full precision for the reference
        self.W = W.astype(self.matmul_dtype)          # bf16 option halves W DMA bytes
        self.b = b                                    # bias stays f32 (post-matmul add)

    def _pick_tile(self, B):
        # Big tile to amortize the ~0.35 us/step pipeline overhead, but split so the
        # grid has >= 2 steps (lets "parallel" shard the batch across v7x's 2 TCs).
        if B <= 8:
            return B
        half = -(-B // 2)
        half = ((half + 7) // 8) * 8
        return min(self.tile_b, half)

    def __call__(self, x, actions=None):
        flag = (x.ndim == 1)
        if flag:
            x = x[None, :]
        B = x.shape[0]
        d = self.output_dim
        compute_q = actions is not None

        tile_b = self._pick_tile(B)
        grid = (pl.cdiv(B, tile_b),)

        kernel = functools.partial(_naf_kernel, self.a_min, self.a_max, d,
                                   self.n_tril, compute_q, self.matmul_dtype)

        in_specs = [
            pl.BlockSpec((tile_b, self.in_dim), lambda i: (i, 0)),        # x (batch tiled)
            pl.BlockSpec((self.in_dim, self.out_pad), lambda i: (0, 0)),  # fused W (resident)
            pl.BlockSpec((1, self.out_pad), lambda i: (0, 0)),            # bias
            pl.BlockSpec((self.n_tril, d * d), lambda i: (0, 0)),         # tril->L scatter
        ]
        args = [x, self.W, self.b, self.scat]
        if compute_q:
            in_specs += [
                pl.BlockSpec((d, self.n_tril), lambda i: (0, 0)),         # rows one-hot
                pl.BlockSpec((self.n_tril, d), lambda i: (0, 0)),         # cols one-hot
                pl.BlockSpec((tile_b, d), lambda i: (i, 0)),              # actions
            ]
            act = jnp.asarray(actions, jnp.float32).reshape(B, d)
            args += [self.rows_oh, self.cols_oh, act]

        out_specs = [
            pl.BlockSpec((tile_b, d), lambda i: (i, 0)),                  # mu
            pl.BlockSpec((tile_b, 1), lambda i: (i, 0)),                  # V
        ]
        out_shapes = [
            jax.ShapeDtypeStruct((B, d), jnp.float32),
            jax.ShapeDtypeStruct((B, 1), jnp.float32),
        ]
        if compute_q:
            out_specs.append(pl.BlockSpec((tile_b, 1), lambda i: (i, 0)))  # Q
            out_shapes.append(jax.ShapeDtypeStruct((B, 1), jnp.float32))
        out_specs.append(pl.BlockSpec((tile_b, d * d), lambda i: (i, 0)))  # L (flat)
        out_shapes.append(jax.ShapeDtypeStruct((B, d * d), jnp.float32))

        n_out_lanes = 1 + d + d * d + (1 if compute_q else 0)
        cost = pl.CostEstimate(
            flops=(2 * B * self.in_dim * self.out_pad
                   + 2 * B * self.n_tril * d * d
                   + (4 * B * self.n_tril * d if compute_q else 0)),
            transcendentals=3 * B * (d + self.n_tril),
            bytes_accessed=(B * self.in_dim * x.dtype.itemsize
                            + self.in_dim * self.out_pad * self.matmul_dtype.itemsize
                            + (B * d * 4 if compute_q else 0)
                            + B * n_out_lanes * 4),
        )

        outs = pl.pallas_call(
            kernel,
            grid=grid,
            in_specs=in_specs,
            out_specs=tuple(out_specs),
            out_shape=tuple(out_shapes),
            compiler_params=pltpu.CompilerParams(
                dimension_semantics=("parallel",)),   # batch tiles across v7x's 2 TCs
            cost_estimate=cost,
        )(*args)

        if compute_q:
            mu, V, Q, L_flat = outs
        else:
            mu, V, L_flat = outs
            Q = None
        L = L_flat.reshape(B, d, d)                   # free reshape (contiguous)

        if isinstance(self.output_shape, (tuple, list)):
            mu = mu[..., None]
        if flag:
            mu = mu[0]
        return mu, V, Q, L

    # Pure-JAX reference of the torch forward, for correctness checking only.
    def reference(self, x, actions=None, matmul_dtype=jnp.float32):
        if x.ndim == 1:
            x = x[None, :]
        B, d = x.shape[0], self.output_dim
        y = jnp.dot(x.astype(matmul_dtype), self.W_f32.astype(matmul_dtype),
                    preferred_element_type=jnp.float32) + self.b
        V = y[:, 0:1]
        mu = self.a_min + (jnp.tanh(y[:, 1:1 + d]) + 1.0) * (self.a_max - self.a_min) / 2.0
        e = y[:, 1 + d:1 + d + self.n_tril]
        sp = jnp.where(e > 20.0, e, jnp.log1p(jnp.exp(jnp.minimum(e, 20.0)))) + 1e-6
        proc = jnp.where(self.diag_mask_bool[None, :], sp, jnp.clip(e, -10.0, 10.0))
        L = jnp.zeros((B, d, d), jnp.float32).at[:, self.rows_idx, self.cols_idx].set(proc)
        L = jnp.nan_to_num(L, nan=0.0, posinf=1e6, neginf=-1e6)
        Q = None
        if actions is not None:
            diff = jnp.asarray(actions, jnp.float32).reshape(B, d) - mu
            P = L @ jnp.swapaxes(L, -1, -2)
            Q = V - 0.5 * jnp.einsum('bi,bij,bj->b', diff, P, diff)[:, None]
        return mu, V, Q, L
    # TODO(synk): torch's runtime assert that min(diag(L)) > 0 is not re-checked
    # in-kernel; it is true by construction (softplus + 1e-6 jitter on the diagonal).


if __name__ == "__main__":
    key = jax.random.PRNGKey(0)
    k_x, k_a, k_p, k_x2, k_a2 = jax.random.split(key, 5)

    in_dim, action_dim = 32, 4
    model = NAFOutput1Pallas(in_dim, action_dim, a_max=1.0, a_min=-1.0, key=k_p)

    # --- small batch, single tile, with actions ---
    B = 4
    x = jax.random.normal(k_x, (B, in_dim), jnp.float32)
    actions = jax.random.uniform(k_a, (B, action_dim), jnp.float32,
                                 minval=-1.0, maxval=1.0)
    mu, V, Q, L = model(x, actions)
    jax.block_until_ready((mu, V, Q, L))
    mu_r, V_r, Q_r, L_r = model.reference(x, actions)
    for got, want in ((mu, mu_r), (V, V_r), (Q, Q_r), (L, L_r)):
        np.testing.assert_allclose(np.asarray(got), np.asarray(want),
                                   rtol=1e-5, atol=1e-5)

    # --- actions=None path: Q work skipped inside the kernel, Q is None ---
    mu2, V2, Q2, L2 = model(x)
    jax.block_until_ready((mu2, V2, L2))
    assert Q2 is None
    np.testing.assert_allclose(np.asarray(mu2), np.asarray(mu_r), rtol=1e-5, atol=1e-5)
    np.testing.assert_allclose(np.asarray(V2), np.asarray(V_r), rtol=1e-5, atol=1e-5)
    np.testing.assert_allclose(np.asarray(L2), np.asarray(L_r), rtol=1e-5, atol=1e-5)

    # --- multi-tile grid (2-step "parallel" grid + partial last tile) ---
    B2 = 150                                   # tile_b -> 80, grid=(2,), last tile=70
    x2 = jax.random.normal(k_x2, (B2, in_dim), jnp.float32)
    a2 = jax.random.uniform(k_a2, (B2, action_dim), jnp.float32,
                            minval=-1.0, maxval=1.0)
    mu3, V3, Q3, L3 = model(x2, a2)
    jax.block_until_ready((mu3, V3, Q3, L3))
    mu3r, V3r, Q3r, L3r = model.reference(x2, a2)
    for got, want in ((mu3, mu3r), (V3, V3r), (Q3, Q3r), (L3, L3r)):
        np.testing.assert_allclose(np.asarray(got), np.asarray(want),
                                   rtol=1e-5, atol=1e-5)

    # --- bf16 matmul path (v6e / v7x): x cast in-kernel, epilogue stays f32 ---
    model_bf16 = NAFOutput1Pallas(in_dim, action_dim, a_max=1.0, a_min=-1.0,
                                  key=k_p, matmul_dtype=jnp.bfloat16)
    mub, Vb, Qb, Lb = model_bf16(x, actions)
    jax.block_until_ready((mub, Vb, Qb, Lb))
    mubr, Vbr, Qbr, Lbr = model_bf16.reference(x, actions, matmul_dtype=jnp.bfloat16)
    for got, want in ((mub, mubr), (Vb, Vbr), (Qb, Qbr), (Lb, Lbr)):
        np.testing.assert_allclose(np.asarray(got), np.asarray(want),
                                   rtol=2e-3, atol=2e-3)

    print("KERNEL_OK")
</pallas_src>

<mosaic_0001>
module attributes {stable_mosaic.version = 11 : i64} {
  func.func @_naf_kernel(%arg0: i32, %arg1: memref<4x32xf32, #tpu.memory_space<vmem>>, %arg2: memref<32x128xf32, #tpu.memory_space<vmem>>, %arg3: memref<1x128xf32, #tpu.memory_space<vmem>>, %arg4: memref<10x16xf32, #tpu.memory_space<vmem>>, %arg5: memref<4x10xf32, #tpu.memory_space<vmem>>, %arg6: memref<10x4xf32, #tpu.memory_space<vmem>>, %arg7: memref<4x4xf32, #tpu.memory_space<vmem>>, %arg8: memref<4x4xf32, #tpu.memory_space<vmem>>, %arg9: memref<4x1xf32, #tpu.memory_space<vmem>>, %arg10: memref<4x1xf32, #tpu.memory_space<vmem>>, %arg11: memref<4x16xf32, #tpu.memory_space<vmem>>) attributes {dimension_semantics = [#tpu.dimension_semantics<parallel>], iteration_bounds = array<i64: 1>, scalar_prefetch = 0 : i64, scratch_operands = 0 : i64, tpu.core_type = #tpu.core_type<tc>, window_params = [{transform_indices = @transform_0, window_bounds = array<i64: 4, 32>}, {pipeline_mode = #tpu.pipeline_mode<synchronous>, transform_indices = @transform_1, window_bounds = array<i64: 32, 128>}, {pipeline_mode = #tpu.pipeline_mode<synchronous>, transform_indices = @transform_2, window_bounds = array<i64: 1, 128>}, {pipeline_mode = #tpu.pipeline_mode<synchronous>, transform_indices = @transform_3, window_bounds = array<i64: 10, 16>}, {pipeline_mode = #tpu.pipeline_mode<synchronous>, transform_indices = @transform_4, window_bounds = array<i64: 4, 10>}, {pipeline_mode = #tpu.pipeline_mode<synchronous>, transform_indices = @transform_5, window_bounds = array<i64: 10, 4>}, {transform_indices = @transform_6, window_bounds = array<i64: 4, 4>}, {transform_indices = @transform_7, window_bounds = array<i64: 4, 4>}, {transform_indices = @transform_8, window_bounds = array<i64: 4, 1>}, {transform_indices = @transform_9, window_bounds = array<i64: 4, 1>}, {transform_indices = @transform_10, window_bounds = array<i64: 4, 16>}]} {
    %c0 = arith.constant 0 : index
    %c0_0 = arith.constant 0 : index
    %0 = vector.load %arg1[%c0, %c0_0] : memref<4x32xf32, #tpu.memory_space<vmem>>, vector<4x32xf32>
    %c0_1 = arith.constant 0 : index
    %c0_2 = arith.constant 0 : index
    %1 = vector.load %arg2[%c0_1, %c0_2] : memref<32x128xf32, #tpu.memory_space<vmem>>, vector<32x128xf32>
    %cst = arith.constant dense<0.000000e+00> : vector<4x128xf32>
    %2 = tpu.matmul %0, %1, %cst {dimension_numbers = #tpu.dot_dimension_numbers<[1], [0], [0], [1], [0, 0, 1, 1], [], []>} : vector<4x32xf32>, vector<32x128xf32>, vector<4x128xf32> -> vector<4x128xf32>
    %c0_3 = arith.constant 0 : index
    %c0_4 = arith.constant 0 : index
    %3 = vector.load %arg3[%c0_3, %c0_4] : memref<1x128xf32, #tpu.memory_space<vmem>>, vector<1x128xf32>
    %4 = vector.broadcast %3 : vector<1x128xf32> to vector<4x128xf32>
    %5 = arith.addf %2, %4 : vector<4x128xf32>
    %6 = vector.extract_strided_slice %5 {offsets = [0, 0], sizes = [4, 1], strides = [1, 1]} : vector<4x128xf32> to vector<4x1xf32>
    %7 = vector.extract_strided_slice %5 {offsets = [0, 1], sizes = [4, 4], strides = [1, 1]} : vector<4x128xf32> to vector<4x4xf32>
    %8 = math.tanh %7 : vector<4x4xf32>
    %cst_5 = arith.constant 1.000000e+00 : f32
    %9 = vector.broadcast %cst_5 : f32 to vector<4x4xf32>
    %10 = arith.addf %8, %9 : vector<4x4xf32>
    %cst_6 = arith.constant 1.000000e+00 : f32
    %11 = vector.broadcast %cst_6 : f32 to vector<4x4xf32>
    %12 = arith.mulf %10, %11 : vector<4x4xf32>
    %cst_7 = arith.constant -1.000000e+00 : f32
    %13 = vector.broadcast %cst_7 : f32 to vector<4x4xf32>
    %14 = arith.addf %13, %12 : vector<4x4xf32>
    %15 = vector.extract_strided_slice %5 {offsets = [0, 5], sizes = [4, 10], strides = [1, 1]} : vector<4x128xf32> to vector<4x10xf32>
    %16 = tpu.iota {dimensions = array<i32: 1>} : vector<1x10xi32>
    %c0_i32 = arith.constant 0 : i32
    %17 = vector.broadcast %c0_i32 : i32 to vector<1x10xi32>
    %18 = arith.cmpi slt, %16, %17 : vector<1x10xi32>
    %c0_i32_8 = arith.constant 0 : i32
    %19 = vector.broadcast %c0_i32_8 : i32 to vector<1x10xi32>
    %20 = arith.cmpi eq, %16, %19 : vector<1x10xi32>
    %21 = arith.ori %18, %20 : vector<1x10xi1>
    %c2_i32 = arith.constant 2 : i32
    %22 = vector.broadcast %c2_i32 : i32 to vector<1x10xi32>
    %23 = arith.cmpi eq, %16, %22 : vector<1x10xi32>
    %24 = arith.ori %21, %23 : vector<1x10xi1>
    %c5_i32 = arith.constant 5 : i32
    %25 = vector.broadcast %c5_i32 : i32 to vector<1x10xi32>
    %26 = arith.cmpi eq, %16, %25 : vector<1x10xi32>
    %27 = arith.ori %24, %26 : vector<1x10xi1>
    %c9_i32 = arith.constant 9 : i32
    %28 = vector.broadcast %c9_i32 : i32 to vector<1x10xi32>
    %29 = arith.cmpi eq, %16, %28 : vector<1x10xi32>
    %30 = arith.ori %27, %29 : vector<1x10xi1>
    %cst_9 = arith.constant 2.000000e+01 : f32
    %31 = vector.broadcast %cst_9 : f32 to vector<4x10xf32>
    %32 = arith.cmpf ogt, %15, %31 : vector<4x10xf32>
    %cst_10 = arith.constant 2.000000e+01 : f32
    %33 = vector.broadcast %cst_10 : f32 to vector<4x10xf32>
    %34 = arith.minimumf %15, %33 : vector<4x10xf32>
    %35 = math.exp %34 : vector<4x10xf32>
    %36 = math.log1p %35 : vector<4x10xf32>
    %37 = arith.select %32, %15, %36 : vector<4x10xi1>, vector<4x10xf32>
    %cst_11 = arith.constant 9.99999997E-7 : f32
    %38 = vector.broadcast %cst_11 : f32 to vector<4x10xf32>
    %39 = arith.addf %37, %38 : vector<4x10xf32>
    %cst_12 = arith.constant -1.000000e+01 : f32
    %cst_13 = arith.constant 1.000000e+01 : f32
    %40 = vector.broadcast %cst_12 : f32 to vector<4x10xf32>
    %41 = arith.maximumf %40, %15 : vector<4x10xf32>
    %42 = vector.broadcast %cst_13 : f32 to vector<4x10xf32>
    %43 = arith.minimumf %42, %41 : vector<4x10xf32>
    %44 = vector.shape_cast %30 : vector<1x10xi1> to vector<1x10xi1>
    %45 = vector.broadcast %44 : vector<1x10xi1> to vector<4x10xi1>
    %46 = arith.select %45, %39, %43 : vector<4x10xi1>, vector<4x10xf32>
    %cst_14 = arith.constant 0.000000e+00 : f32
    %cst_15 = arith.constant -1.000000e+06 : f32
    %cst_16 = arith.constant 1.000000e+06 : f32
    %47 = arith.cmpf one, %46, %46 : vector<4x10xf32>
    %48 = vector.broadcast %cst_14 : f32 to vector<4x10xf32>
    %49 = arith.select %47, %48, %46 : vector<4x10xi1>, vector<4x10xf32>
    %cst_17 = arith.constant 0x7F800000 : f32
    %50 = vector.broadcast %cst_17 : f32 to vector<4x10xf32>
    %51 = arith.cmpf oeq, %49, %50 : vector<4x10xf32>
    %52 = vector.broadcast %cst_16 : f32 to vector<4x10xf32>
    %53 = arith.select %51, %52, %49 : vector<4x10xi1>, vector<4x10xf32>
    %cst_18 = arith.constant 0xFF800000 : f32
    %54 = vector.broadcast %cst_18 : f32 to vector<4x10xf32>
    %55 = arith.cmpf oeq, %53, %54 : vector<4x10xf32>
    %56 = vector.broadcast %cst_15 : f32 to vector<4x10xf32>
    %57 = arith.select %55, %56, %53 : vector<4x10xi1>, vector<4x10xf32>
    %c0_19 = arith.constant 0 : index
    %c0_20 = arith.constant 0 : index
    %58 = vector.load %arg8[%c0_19, %c0_20] : memref<4x4xf32, #tpu.memory_space<vmem>>, vector<4x4xf32>
    tpu.vector_store %arg8[%c0_19, %c0_20], %14 {strides = array<i32>} : memref<4x4xf32, #tpu.memory_space<vmem>>, vector<4x4xf32>,
    %c0_21 = arith.constant 0 : index
    %c0_22 = arith.constant 0 : index
    %59 = vector.load %arg9[%c0_21, %c0_22] : memref<4x1xf32, #tpu.memory_space<vmem>>, vector<4x1xf32>
    tpu.vector_store %arg9[%c0_21, %c0_22], %6 {strides = array<i32>} : memref<4x1xf32, #tpu.memory_space<vmem>>, vector<4x1xf32>,
    %c0_23 = arith.constant 0 : index
    %c0_24 = arith.constant 0 : index
    %60 = vector.load %arg4[%c0_23, %c0_24] : memref<10x16xf32, #tpu.memory_space<vmem>>, vector<10x16xf32>
    %cst_25 = arith.constant dense<0.000000e+00> : vector<4x16xf32>
    %61 = tpu.matmul %57, %60, %cst_25 {dimension_numbers = #tpu.dot_dimension_numbers<[1], [0], [0], [1], [0, 0, 1, 1], [], []>} : vector<4x10xf32>, vector<10x16xf32>, vector<4x16xf32> -> vector<4x16xf32>
    %c0_26 = arith.constant 0 : index
    %c0_27 = arith.constant 0 : index
    %62 = vector.load %arg11[%c0_26, %c0_27] : memref<4x16xf32, #tpu.memory_space<vmem>>, vector<4x16xf32>
    tpu.vector_store %arg11[%c0_26, %c0_27], %61 {strides = array<i32>} : memref<4x16xf32, #tpu.memory_space<vmem>>, vector<4x16xf32>,
    %c0_28 = arith.constant 0 : index
    %c0_29 = arith.constant 0 : index
    %63 = vector.load %arg7[%c0_28, %c0_29] : memref<4x4xf32, #tpu.memory_space<vmem>>, vector<4x4xf32>
    %64 = arith.subf %63, %14 : vector<4x4xf32>
    %c0_30 = arith.constant 0 : index
    %c0_31 = arith.constant 0 : index
    %65 = vector.load %arg5[%c0_30, %c0_31] : memref<4x10xf32, #tpu.memory_space<vmem>>, vector<4x10xf32>
    %cst_32 = arith.constant dense<0.000000e+00> : vector<4x10xf32>
    %66 = tpu.matmul %64, %65, %cst_32 {dimension_numbers = #tpu.dot_dimension_numbers<[1], [0], [0], [1], [0, 0, 1, 1], [], []>} : vector<4x4xf32>, vector<4x10xf32>, vector<4x10xf32> -> vector<4x10xf32>
    %67 = arith.mulf %57, %66 : vector<4x10xf32>
    %c0_33 = arith.constant 0 : index
    %c0_34 = arith.constant 0 : index
    %68 = vector.load %arg6[%c0_33, %c0_34] : memref<10x4xf32, #tpu.memory_space<vmem>>, vector<10x4xf32>
    %cst_35 = arith.constant dense<0.000000e+00> : vector<4x4xf32>
    %69 = tpu.matmul %67, %68, %cst_35 {dimension_numbers = #tpu.dot_dimension_numbers<[1], [0], [0], [1], [0, 0, 1, 1], [], []>} : vector<4x10xf32>, vector<10x4xf32>, vector<4x4xf32> -> vector<4x4xf32>
    %70 = arith.mulf %69, %69 : vector<4x4xf32>
    %cst_36 = arith.constant dense<0.000000e+00> : vector<4xf32>
    %71 = vector.multi_reduction <add>, %70, %cst_36 [1] : vector<4x4xf32> to vector<4xf32>
    %72 = vector.shape_cast %71 : vector<4xf32> to vector<4x1xf32>
    %cst_37 = arith.constant 5.000000e-01 : f32
    %73 = vector.broadcast %cst_37 : f32 to vector<4x1xf32>
    %74 = arith.mulf %73, %72 : vector<4x1xf32>
    %75 = arith.subf %6, %74 : vector<4x1xf32>
    %c0_38 = arith.constant 0 : index
    %c0_39 = arith.constant 0 : index
    %76 = vector.load %arg10[%c0_38, %c0_39] : memref<4x1xf32, #tpu.memory_space<vmem>>, vector<4x1xf32>
    tpu.vector_store %arg10[%c0_38, %c0_39], %75 {strides = array<i32>} : memref<4x1xf32, #tpu.memory_space<vmem>>, vector<4x1xf32>,
    return
  }
  func.func @transform_0(%arg0: i32) -> (i32, i32) {
    %c0_i32 = arith.constant 0 : i32
    %c0_i32_0 = arith.constant 0 : i32
    return %arg0, %c0_i32 : i32, i32
  }
  func.func @transform_1(%arg0: i32) -> (i32, i32) {
    %c0_i32 = arith.constant 0 : i32
    %c0_i32_0 = arith.constant 0 : i32
    %c0_i32_1 = arith.constant 0 : i32
    return %c0_i32, %c0_i32_0 : i32, i32
  }
  func.func @transform_2(%arg0: i32) -> (i32, i32) {
    %c0_i32 = arith.constant 0 : i32
    %c0_i32_0 = arith.constant 0 : i32
    %c0_i32_1 = arith.constant 0 : i32
    return %c0_i32, %c0_i32_0 : i32, i32
  }
  func.func @transform_3(%arg0: i32) -> (i32, i32) {
    %c0_i32 = arith.constant 0 : i32
    %c0_i32_0 = arith.constant 0 : i32
    %c0_i32_1 = arith.constant 0 : i32
    return %c0_i32, %c0_i32_0 : i32, i32
  }
  func.func @transform_4(%arg0: i32) -> (i32, i32) {
    %c0_i32 = arith.constant 0 : i32
    %c0_i32_0 = arith.constant 0 : i32
    %c0_i32_1 = arith.constant 0 : i32
    return %c0_i32, %c0_i32_0 : i32, i32
  }
  func.func @transform_5(%arg0: i32) -> (i32, i32) {
    %c0_i32 = arith.constant 0 : i32
    %c0_i32_0 = arith.constant 0 : i32
    %c0_i32_1 = arith.constant 0 : i32
    return %c0_i32, %c0_i32_0 : i32, i32
  }
  func.func @transform_6(%arg0: i32) -> (i32, i32) {
    %c0_i32 = arith.constant 0 : i32
    %c0_i32_0 = arith.constant 0 : i32
    return %arg0, %c0_i32 : i32, i32
  }
  func.func @transform_7(%arg0: i32) -> (i32, i32) {
    %c0_i32 = arith.constant 0 : i32
    %c0_i32_0 = arith.constant 0 : i32
    return %arg0, %c0_i32 : i32, i32
  }
  func.func @transform_8(%arg0: i32) -> (i32, i32) {
    %c0_i32 = arith.constant 0 : i32
    %c0_i32_0 = arith.constant 0 : i32
    return %arg0, %c0_i32 : i32, i32
  }
  func.func @transform_9(%arg0: i32) -> (i32, i32) {
    %c0_i32 = arith.constant 0 : i32
    %c0_i32_0 = arith.constant 0 : i32
    return %arg0, %c0_i32 : i32, i32
  }
  func.func @transform_10(%arg0: i32) -> (i32, i32) {
    %c0_i32 = arith.constant 0 : i32
    %c0_i32_0 = arith.constant 0 : i32
    return %arg0, %c0_i32 : i32, i32
  }
}

</mosaic_0001>

<bundles_post_ra>
// kernel: tpu_custom_call.1
= control target key start
LH: loop header
LB: loop body
LE: loop exit
PB: predicated region body
PF: predicated region fallthrough
CT: control target
= control target key end

     0   :  { %16 = vsyncpa [#allocation3], 0  ;;  %s618_s0 = inlined_call_operand.vmem [shape: f32[4,32], index: 0, kind: input, shape index: {}]   ;;  %s619_s1 = inlined_call_operand.hbm [shape: f32[32,128], index: 1, kind: input, shape index: {}]   ;;  %s620_s2 = inlined_call_operand.hbm [shape: f32[1,128], index: 2, kind: input, shape index: {}]   ;;  %s621_s3 = inlined_call_operand.vmem [shape: f32[10,16], index: 3, kind: input, shape index: {}]   ;;  %s622_s4 = inlined_call_operand.hbm [shape: f32[4,10], index: 4, kind: input, shape index: {}]   ;;  %s623_s5 = inlined_call_operand.vmem [shape: f32[10,4], index: 5, kind: input, shape index: {}]   ;;  %s624_s6 = inlined_call_operand.hbm [shape: f32[4,4], index: 6, kind: input, shape index: {}]   ;;  %s625_s7 = inlined_call_operand.hbm [shape: f32[4,4], index: 7, kind: output, shape index: {0}]   ;;  %s626_s8 = inlined_call_operand.vmem [shape: f32[4,1], index: 8, kind: output, shape index: {1}]   ;;  %s627_s9 = inlined_call_operand.vmem [shape: f32[4,1], index: 9, kind: output, shape index: {2}]   ;;  %s628_s10 = inlined_call_operand.hbm [shape: f32[4,16], index: 10, kind: output, shape index: {3}]  }
   0x1   :  { %17 = vsyncpa [#allocation6], 0 }
   0x2   :  { %18 = vsyncpa [#allocation9], 0 }
   0x3   :  { %19 = vsyncpa [#allocation4], 0  ;;  %s41_s15 = sshll.u32 %s620_s2, 4  ;;  %s42_s15 = int_to_ptr.hbm [resolvable:$true] %s41_s15 }
   0x4   :  { %20 = vsyncpa [#allocation12], 0  ;;  %s499_s16 = smov [#allocation5]   ;;  %s27_s20 = sshll.u32 %s619_s1, 4  ;;  %s28_s20 = int_to_ptr.hbm [resolvable:$true] %s27_s20 }
   0x5   :  { %s43_s17 = sshll.u32 %s499_s16, 4  ;;  %s500_s21 = smov [#allocation2]   ;;  %s44_s17 = int_to_ptr.vmem [resolvable:$true] %s43_s17 }
   0x6   :  { %46 = dma.hbm_to_vmem [thread:$0]  %s42_s15, 16, %s44_s17, [#allocation6]  }
   0x7   :  { %s29_s22 = sshll.u32 %s500_s21, 4  ;;  %s501_s23 = smov 128   ;;  %s30_s22 = int_to_ptr.vmem [resolvable:$true] %s29_s22 }
   0x8   :  { %s502_s24 = smov 8   ;;  %s54_s2 = sshll.u32 %s622_s4, 4  ;;  %s55_s2 = int_to_ptr.hbm [resolvable:$true] %s54_s2 }
   0x9   :  { %35 = dma.hbm_to_vmem [thread:$0]  %s28_s20, 512, %s30_s22, [#allocation3], %s501_s23, %s501_s23, %s502_s24  }
   0xa   :  { %s503_s27 = smov [#allocation7]   ;;  %s67_s1 = sshll.u32 %s624_s6, 4  ;;  %s68_s1 = int_to_ptr.hbm [resolvable:$true] %s67_s1 }
   0xb   :  { %s56_s28 = sshll.u32 %s503_s27, 4  ;;  %s504_s11 = smov [#allocation8]   ;;  %s57_s28 = int_to_ptr.vmem [resolvable:$true] %s56_s28 }
   0xc   :  { %59 = dma.hbm_to_vmem [thread:$0]  %s55_s2, 64, %s57_s28, [#allocation6]  }
   0xd   :  { %s69_s12 = sshll.u32 %s504_s11, 4  ;;  %s70_s12 = int_to_ptr.vmem [resolvable:$true] %s69_s12 }
   0xe   :  { %72 = dma.hbm_to_vmem [thread:$0]  %s68_s1, 64, %s70_s12, [#allocation9]  }
   0xf   :  { %489 = dma.done.wait [#allocation3], 512  }
  0x10   :  { %490 = vsyncadd [#allocation3], 4294966784 }
  0x11   :  { %491 = dma.done.wait [#allocation6], 80  }
  0x12   :  { %492 = vsyncadd [#allocation6], 4294967216 }
  0x13   :  { %493 = dma.done.wait [#allocation9], 64  }
  0x14   :  { %494 = vsyncadd [#allocation9], 4294967232  ;;  %v93_v0 = vld [vmem:[#allocation2 + $0x18] sm:$0xff]  ;;  %v92_v1 = vld [vmem:[#allocation2 + $0x10] sm:$0xff]  ;;  %vm98_vm0 = vcmask 261120   ;;  %vm176_vm1 = vcmask 3072   ;;  %v125_v28 = vlaneseq }
  0x15   :  { %114 = vmatpush.msra.mxu0 %v93_v0  ;;  %v91_v2 = vld [vmem:[#allocation2 + $0x8] sm:$0xff]  ;;  %v90_v3 = vld [vmem:[#allocation2] sm:$0xff]  ;;  %s506_s15 = smov 127   ;;  %vm217_vm4 = vcmask 1043456   ;;  %vm184_vm5 = vcmask 1041408   ;;  %vm174_vm6 = vcmask 27648  }
  0x16   :  { %v89_v4 = vld [vmem:[%s618_s0] sm:$0xf]  ;;  %s505_s0 = smov 123   ;;  %v179_v26 = vld [vmem:[%s621_s3 + $0x8] sm:$0x3]  ;;  %vm213_vm7 = vcmask 31744  }
  0x17   :  { %115 = vmatpush.msra.mxu0 %v92_v1  ;;  %v338_v5 = vld [vmem:[#allocation5] ss:$0 sm:$0xff]  ;;  %v212_v25 = vld [vmem:[#allocation7] sm:$0xf]  ;;  %322 = vmatpush.msk.msra.mxu1 %vm184_vm5, %v179_v26  ;;  %v210_v29 = vld [vmem:[#allocation8] sm:$0xf] }
  0x18   :  { %324 = vmatpush.msk.msra.mxu2 %vm217_vm4, %v212_v25  ;;  %v178_v27 = vld [vmem:[%s621_s3] sm:$0xff]  ;;  %v126_v31 = vand.u32 127, %v125_v28  ;;  %v243_v39 = vld [vmem:[%s623_s5 + $0x8] sm:$0x3]  ;;  %vm208_vm4 = vcmask 125952   ;;  %s507_s22 = smov [#allocation10]  }
  0x19   :  { %116 = vmatpush.msra.mxu0 %v91_v2  ;;  %203 = vmatpush.msra.mxu1 %v178_v27  ;;  %v242_v40 = vld [vmem:[%s623_s5] sm:$0xff]  ;;  %s282_s23 = sshll.u32 %s507_s22, 4  ;;  %s284_s26 = sshll.u32 %s625_s7, 4  ;;  %s283_s23 = int_to_ptr.vmem [resolvable:$true] %s282_s23  ;;  %s285_s26 = int_to_ptr.hbm [resolvable:$true] %s284_s26 }
  0x1a   :  { %vm128_vm8 = vcmp.eq.s32.totalorder %v126_v31, 0  ;;  %vm130_vm9 = vcmp.eq.s32.totalorder %v126_v31, 2  ;;  %vm132_vm11 = vcmp.eq.s32.totalorder %v126_v31, 5  ;;  %vm134_vm13 = vcmp.eq.s32.totalorder %v126_v31, 9  ;;  %326 = vmatpush.msk.msra.mxu3 %vm184_vm5, %v243_v39  ;;  %s508_s2 = smov [#allocation11]   ;;  %s299_s29 = sshll.u32 %s628_s10, 4  ;;  %s300_s29 = int_to_ptr.hbm [resolvable:$true] %s299_s29 }
  0x1b   :  { %117 = vmatpush.msra.mxu0 %v90_v3  ;;  %vm131_vm10 = vmor %vm128_vm8, %vm130_vm9  ;;  %s297_s27 = sshll.u32 %s508_s2, 4  ;;  %s298_s27 = int_to_ptr.vmem [resolvable:$true] %s297_s27 }
  0x1c   :  { %320 = vmatmul.msk.f32.vlgmr.msra.gmra.mxu0 %vm98_vm0, %v89_v4  ;;  %vm133_vm12 = vmor %vm131_vm10, %vm132_vm11  ;;  %265 = vmatpush.msra.mxu3 %v242_v40 }
  0x1d   :  { %vm135_vm14 = vmor %vm133_vm12, %vm134_vm13 }
  0x99   :  { %v119_v6 = vpop.f32.mrf.mxu0 }
  0x9a   :  { %v579_v7 = vadd.f32 %v338_v5, %v119_v6 }
  0x9c   :  { %v137_v8 = vmin.f32 %v579_v7, 20.0  ;;  %v321_v9 = vclamps-f32 %v579_v7, 10.0  ;;  %339 = vtanh.f32 %v579_v7  ;;  %177 = vst.msk [vmem:[%s626_s8] sm:$0xf] %vm176_vm1, %v579_v7  ;;  %vm136_vm3 = vcmp.gt.f32.partialorder %v579_v7, 20.0 }
  0x9e   :  { %v138_v10 = vmul.f32 1.442695, %v137_v8  ;;  %160 = vrot.lane.b32.xlu1 %v321_v9, %s505_s0 }
  0xa0   :  { %341 = vpow2.f32 %v138_v10 }
  0xa2   :  { %v340_v11 = vpop.eup %339 }
  0xa3   :  { %v123_v12 = vadd.f32 1.0, %v340_v11 }
  0xa5   :  { %v124_v13 = vadd.f32 -1.0, %v123_v12 }
  0xa6   :  { %v342_v14 = vpop.eup %341 }
  0xa7   :  { %171 = vrot.lane.b32.xlu0 %v124_v13, %s506_s15  ;;  %v140_v15 = vadd.f32 1.0, %v342_v14  ;;  %v143_v16 = vmul.f32 -0.5, %v342_v14  ;;  %v146_v18 = vand.u32 2147483647, %v342_v14 }
  0xa9   :  { %343 = vlog2.f32 %v140_v15  ;;  %v144_v17 = vadd.f32 1.0, %v143_v16  ;;  %vm147_vm2 = vcmp.lt.f32.partialorder %v146_v18, 0.0004427343 }
  0xab   :  { %v145_v21 = vmul.f32 %v342_v14, %v144_v17 }
  0xaf   :  { %v344_v19 = vpop.eup %343 }
  0xb0   :  { %v142_v20 = vmul.f32 0.6931472, %v344_v19 }
  0xb2   :  { %v148_v22 = vsel %vm147_vm2, %v145_v21, %v142_v20  ;;  %vm180_vm2 = vcmask 80896  }
  0xb3   :  { %v149_v23 = vsel %vm136_vm3, %v579_v7, %v148_v22 }
  0xb4   :  { %v150_v24 = vadd.f32 1e-06, %v149_v23 }
  0xb6   :  { %156 = vrot.lane.b32.xlu0 %v150_v24, %s505_s0 }
 0x110   :  { %v161_v33 = vpop.permute.xlu1 %160 }
 0x119   :  { %v172_v30 = vpop.permute.xlu0 %171 }
 0x11a   :  { %v211_v32 = vsub.f32 %v210_v29, %v172_v30  ;;  %175 = vst.msk [vmem:[#allocation10] sm:$0xf] %vm174_vm6, %v172_v30 }
 0x11b   :  { %287 = dma.vmem_to_hbm [thread:$0]  %s283_s23, 64, %s285_s26, [#allocation4]  }
 0x11c   :  { %325 = vmatmul.msk.f32.vlgmr.msra.gmra.mxu2 %vm213_vm7, %v211_v32 }
 0x128   :  { %v157_v34 = vpop.permute.xlu0 %156 }
 0x129   :  { %v163_v35 = vsel %vm135_vm14, %v157_v34, %v161_v33 }
 0x12a   :  { %vm164_vm15 = vcmp.ne.f32.partialorder %v163_v35, %v163_v35 }
 0x12b   :  { %v165_v36 = vsel %vm164_vm15, 0.0, %v163_v35 }
 0x12c   :  { %vm166_vm0 = vcmp.eq.f32.partialorder %v165_v36, inf }
 0x12d   :  { %v167_v37 = vsel %vm166_vm0, 1000000.0, %v165_v36 }
 0x12e   :  { %vm168_vm3 = vcmp.eq.f32.partialorder %v167_v37, -inf }
 0x12f   :  { %v169_v38 = vsel %vm168_vm3, -1000000.0, %v167_v37 }
 0x130   :  { %323 = vmatmul.msk.f32.vlgmr.msra.gmra.mxu1 %vm180_vm2, %v169_v38 }
 0x19f   :  { %v238_v41 = vpop.f32.mrf.mxu2 }
 0x1a0   :  { %v241_v42 = vmul.f32 %v238_v41, %v169_v38 }
 0x1a2   :  { %327 = vmatmul.msk.f32.vlgmr.msra.gmra.mxu3 %vm180_vm2, %v241_v42 }
 0x1ad   :  { %v205_v43 = vpop.f32.mrf.mxu1 }
 0x1ae   :  { %209 = vst.msk [vmem:[#allocation11] sm:$0xf] %vm208_vm4, %v205_v43 }
 0x1af   :  { %302 = dma.vmem_to_hbm [thread:$0]  %s298_s27, 64, %s300_s29, [#allocation12]  }
 0x225   :  { %v267_v44 = vpop.f32.mrf.mxu3 }
 0x226   :  { %v270_v45 = vmul.f32 %v267_v44, %v267_v44 }
 0x228   :  { %v271_v46 = vsel %vm174_vm6, %v270_v45, 0.0 }
 0x229   :  { %272 = vadd.xlane.f32.xlu1 %v271_v46 }
 0x29c   :  { %v273_v47 = vpop.xlane.xlu1 %272 }
 0x29d   :  { %v274_v48 = vmul.f32 0.5, %v273_v47 }
 0x29f   :  { %v275_v49 = vsub.f32 %v579_v7, %v274_v48 }
 0x2a1   :  { %276 = vst.msk [vmem:[%s627_s9] sm:$0xf] %vm176_vm1, %v275_v49 }
 0x2a2   :  { %495 = dma.done.wait [#allocation4], 64  }
 0x2a3   :  { %496 = vsyncadd [#allocation4], 4294967232 }
 0x2a4   :  { %497 = dma.done.wait [#allocation12], 64  }
 0x2a5   :  { %498 = vsyncadd [#allocation12], 4294967232 }
 0x2a6   :  { %315 = vsyncpa [#allocation3], 1 }
 0x2a7   :  { %316 = vsyncpa [#allocation6], 1 }
 0x2a8   :  { %317 = vsyncpa [#allocation9], 1 }
 0x2a9   :  { %318 = vsyncpa [#allocation4], 1 }
 0x2aa   :  { %319 = vsyncpa [#allocation12], 1 }

</bundles_post_ra>
